<compile_context>
chip_gen: v5e
topology: v5e:2x2
jax: 0.10.0
libtpu: 0.0.40
codegen_flags: <defaults>
</compile_context>

<pallas_src>
import functools
import math

import jax
import jax.numpy as jnp
from jax.experimental import pallas as pl
from jax.experimental.pallas import tpu as pltpu

LN_EPS = 1e-5  # nn.LayerNorm default


def _gelu_exact(x):
    # F.gelu default = exact erf form
    return 0.5 * x * (1.0 + jax.lax.erf(x * (1.0 / math.sqrt(2.0))))


# ------------------------------ Pallas kernel --------------------------------
def ffn_kernel(x_ref, nw_ref, nb_ref, w1_ref, b1_ref, w2_ref, b2_ref,
               o_ref, xn_ref, acc_ref):
    h = pl.program_id(1)

    # Init (once per token tile): LayerNorm into scratch; seed the accumulator
    # with the residual + second bias so the finalize step is a pure store.
    @pl.when(h == 0)
    def _():
        x = x_ref[...]
        mu = jnp.mean(x, axis=-1, keepdims=True)
        var = jnp.mean(jnp.square(x - mu), axis=-1, keepdims=True)
        xn_ref[...] = (x - mu) * jax.lax.rsqrt(var + LN_EPS) * nw_ref[...] + nb_ref[...]
        acc_ref[...] = x + b2_ref[...]

    # One hidden chunk: (tm, dim) @ (dim, th) -> +b1 -> gelu -> (tm, th) @ (th, dim)
    hid = jnp.dot(xn_ref[...], w1_ref[...],
                  preferred_element_type=jnp.float32) + b1_ref[...]
    hid = _gelu_exact(hid)
    acc_ref[...] += jnp.dot(hid, w2_ref[...], preferred_element_type=jnp.float32)

    # Finalize: store the lane-dense output tile.
    @pl.when(h == pl.num_programs(1) - 1)
    def _():
        o_ref[...] = acc_ref[...].astype(o_ref.dtype)


def ffn_forward(x, params, *, tm=None, th=None):
    """x: (..., dim) float32.  params: norm_w/norm_b (1,dim), w1 (dim,4dim),
    b1 (1,4dim), w2 (4dim,dim), b2 (1,dim)."""
    orig_shape = x.shape
    dim = orig_shape[-1]
    m = int(math.prod(orig_shape[:-1]))
    hidden = params["w1"].shape[1]

    xf = x.reshape(m, dim)

    # Token tile (parallel axis) and hidden tile (reduction axis).
    if tm is None:
        tm = m if m <= 128 else 128
    if th is None:
        th = hidden if hidden <= 512 else 512
    assert m % tm == 0 and hidden % th == 0
    assert dim % 128 == 0, "dim should be a multiple of 128 for lane-dense tiles"

    grid = (m // tm, hidden // th)

    # Advisory cost estimate for XLA's scheduler around the custom call.
    cost = pl.CostEstimate(
        flops=4 * m * dim * hidden,
        transcendentals=m * hidden,
        bytes_accessed=4 * (2 * m * dim + 2 * dim * hidden + hidden + 3 * dim),
    )

    out = pl.pallas_call(
        ffn_kernel,
        out_shape=jax.ShapeDtypeStruct((m, dim), jnp.float32),
        grid=grid,
        in_specs=[
            pl.BlockSpec((tm, dim), lambda i, h: (i, 0)),    # x tile (resident over h)
            pl.BlockSpec((1, dim), lambda i, h: (0, 0)),     # norm_w
            pl.BlockSpec((1, dim), lambda i, h: (0, 0)),     # norm_b
            pl.BlockSpec((dim, th), lambda i, h: (0, h)),    # w1 chunk (streamed)
            pl.BlockSpec((1, th), lambda i, h: (0, h)),      # b1 chunk
            pl.BlockSpec((th, dim), lambda i, h: (h, 0)),    # w2 chunk (streamed)
            pl.BlockSpec((1, dim), lambda i, h: (0, 0)),     # b2
        ],
        out_specs=pl.BlockSpec((tm, dim), lambda i, h: (i, 0)),
        scratch_shapes=[
            pltpu.VMEM((tm, dim), jnp.float32),   # normalized x tile
            pltpu.VMEM((tm, dim), jnp.float32),   # accumulator (skip + b2 + partials)
        ],
        compiler_params=pltpu.CompilerParams(
            dimension_semantics=("parallel", "arbitrary"),
            vmem_limit_bytes=64 * 1024 * 1024,
        ),
        cost_estimate=cost,
    )(xf, params["norm_w"], params["norm_b"],
      params["w1"], params["b1"], params["w2"], params["b2"])

    return out.reshape(orig_shape)


# --------------------------- pure-JAX reference ------------------------------
def ffn_reference(x, params):
    skip = x
    mu = jnp.mean(x, axis=-1, keepdims=True)
    var = jnp.mean(jnp.square(x - mu), axis=-1, keepdims=True)
    h = (x - mu) * jax.lax.rsqrt(var + LN_EPS) * params["norm_w"][0] + params["norm_b"][0]
    h = h @ params["w1"] + params["b1"][0]
    h = _gelu_exact(h)
    h = h @ params["w2"] + params["b2"][0]
    return h + skip


# ------------------------------ param init -----------------------------------
def init_params(key, dim):
    k1, k2, k3, k4, k5, k6 = jax.random.split(key, 6)
    w = lambda k, shp, s: (s * jax.random.normal(k, shp)).astype(jnp.float32)
    return {
        # random (non-default) LN affine + biases so the check is non-trivial
        "norm_w": 1.0 + w(k1, (1, dim), 0.05),
        "norm_b": w(k2, (1, dim), 0.05),
        "w1": w(k3, (dim, 4 * dim), 0.02),
        "b1": w(k5, (1, 4 * dim), 0.02),
        "w2": w(k4, (4 * dim, dim), 0.02),
        "b2": w(k6, (1, dim), 0.02),
    }


# ---------------------------------- main --------------------------------------
if __name__ == "__main__":
    N, S, DIM = 2, 16, 128          # tokens (n, s, dim); hidden = 4*dim = 512

    key = jax.random.PRNGKey(0)
    k_x, k_p = jax.random.split(key)

    x = jax.random.normal(k_x, (N, S, DIM), dtype=jnp.float32)
    params = init_params(k_p, DIM)

    # tm=16 -> 2 token tiles, th=256 -> 2 hidden chunks (exercises both grid axes)
    y = ffn_forward(x, params, tm=16, th=256)
    y_ref = ffn_reference(x, params)
    jax.block_until_ready((y, y_ref))

    assert y.shape == x.shape
    assert jnp.allclose(y, y_ref, atol=2e-3, rtol=2e-3), "mismatch vs reference"
    print("KERNEL_OK")
</pallas_src>

<mosaic_0001>
module attributes {stable_mosaic.version = 11 : i64} {
  func.func @ffn_kernel(%arg0: i32, %arg1: i32, %arg2: memref<16x128xf32, #tpu.memory_space<vmem>>, %arg3: memref<1x128xf32, #tpu.memory_space<vmem>>, %arg4: memref<1x128xf32, #tpu.memory_space<vmem>>, %arg5: memref<128x256xf32, #tpu.memory_space<vmem>>, %arg6: memref<1x256xf32, #tpu.memory_space<vmem>>, %arg7: memref<256x128xf32, #tpu.memory_space<vmem>>, %arg8: memref<1x128xf32, #tpu.memory_space<vmem>>, %arg9: memref<16x128xf32, #tpu.memory_space<vmem>>, %arg10: memref<16x128xf32, #tpu.memory_space<vmem>>, %arg11: memref<16x128xf32, #tpu.memory_space<vmem>>) attributes {dimension_semantics = [#tpu.dimension_semantics<parallel>, #tpu.dimension_semantics<arbitrary>], iteration_bounds = array<i64: 2, 2>, scalar_prefetch = 0 : i64, scratch_operands = 2 : i64, tpu.core_type = #tpu.core_type<tc>, window_params = [{transform_indices = @transform_0, window_bounds = array<i64: 16, 128>}, {pipeline_mode = #tpu.pipeline_mode<synchronous>, transform_indices = @transform_1, window_bounds = array<i64: 1, 128>}, {pipeline_mode = #tpu.pipeline_mode<synchronous>, transform_indices = @transform_2, window_bounds = array<i64: 1, 128>}, {transform_indices = @transform_3, window_bounds = array<i64: 128, 256>}, {transform_indices = @transform_4, window_bounds = array<i64: 1, 256>}, {transform_indices = @transform_5, window_bounds = array<i64: 256, 128>}, {pipeline_mode = #tpu.pipeline_mode<synchronous>, transform_indices = @transform_6, window_bounds = array<i64: 1, 128>}, {transform_indices = @transform_7, window_bounds = array<i64: 16, 128>}]} {
    %c0_i32 = arith.constant 0 : i32
    %0 = arith.cmpi eq, %arg1, %c0_i32 : i32
    %1 = arith.extui %0 : i1 to i32
    %c0_i32_0 = arith.constant 0 : i32
    %2 = arith.cmpi ne, %1, %c0_i32_0 : i32
    scf.if %2 {
      %c0_17 = arith.constant 0 : index
      %c0_18 = arith.constant 0 : index
      %25 = vector.load %arg2[%c0_17, %c0_18] : memref<16x128xf32, #tpu.memory_space<vmem>>, vector<16x128xf32>
      %cst_19 = arith.constant dense<0.000000e+00> : vector<16xf32>
      %26 = vector.multi_reduction <add>, %25, %cst_19 [1] : vector<16x128xf32> to vector<16xf32>
      %27 = vector.shape_cast %26 : vector<16xf32> to vector<16x1xf32>
      %cst_20 = arith.constant 1.280000e+02 : f32
      %28 = vector.broadcast %cst_20 : f32 to vector<16x1xf32>
      %29 = arith.divf %27, %28 : vector<16x1xf32>
      %30 = vector.broadcast %29 : vector<16x1xf32> to vector<16x128xf32>
      %31 = arith.subf %25, %30 : vector<16x128xf32>
      %32 = arith.mulf %31, %31 : vector<16x128xf32>
      %cst_21 = arith.constant dense<0.000000e+00> : vector<16xf32>
      %33 = vector.multi_reduction <add>, %32, %cst_21 [1] : vector<16x128xf32> to vector<16xf32>
      %34 = vector.shape_cast %33 : vector<16xf32> to vector<16x1xf32>
      %cst_22 = arith.constant 1.280000e+02 : f32
      %35 = vector.broadcast %cst_22 : f32 to vector<16x1xf32>
      %36 = arith.divf %34, %35 : vector<16x1xf32>
      %37 = vector.broadcast %29 : vector<16x1xf32> to vector<16x128xf32>
      %38 = arith.subf %25, %37 : vector<16x128xf32>
      %cst_23 = arith.constant 9.99999974E-6 : f32
      %39 = vector.broadcast %cst_23 : f32 to vector<16x1xf32>
      %40 = arith.addf %36, %39 : vector<16x1xf32>
      %41 = math.rsqrt %40 : vector<16x1xf32>
      %42 = vector.broadcast %41 : vector<16x1xf32> to vector<16x128xf32>
      %43 = arith.mulf %38, %42 : vector<16x128xf32>
      %c0_24 = arith.constant 0 : index
      %c0_25 = arith.constant 0 : index
      %44 = vector.load %arg3[%c0_24, %c0_25] : memref<1x128xf32, #tpu.memory_space<vmem>>, vector<1x128xf32>
      %45 = vector.broadcast %44 : vector<1x128xf32> to vector<16x128xf32>
      %46 = arith.mulf %43, %45 : vector<16x128xf32>
      %c0_26 = arith.constant 0 : index
      %c0_27 = arith.constant 0 : index
      %47 = vector.load %arg4[%c0_26, %c0_27] : memref<1x128xf32, #tpu.memory_space<vmem>>, vector<1x128xf32>
      %48 = vector.broadcast %47 : vector<1x128xf32> to vector<16x128xf32>
      %49 = arith.addf %46, %48 : vector<16x128xf32>
      %c0_28 = arith.constant 0 : index
      %c0_29 = arith.constant 0 : index
      %50 = vector.load %arg10[%c0_28, %c0_29] : memref<16x128xf32, #tpu.memory_space<vmem>>, vector<16x128xf32>
      tpu.vector_store %arg10[%c0_28, %c0_29], %49 {strides = array<i32>} : memref<16x128xf32, #tpu.memory_space<vmem>>, vector<16x128xf32>,
      %c0_30 = arith.constant 0 : index
      %c0_31 = arith.constant 0 : index
      %51 = vector.load %arg8[%c0_30, %c0_31] : memref<1x128xf32, #tpu.memory_space<vmem>>, vector<1x128xf32>
      %52 = vector.broadcast %51 : vector<1x128xf32> to vector<16x128xf32>
      %53 = arith.addf %25, %52 : vector<16x128xf32>
      %c0_32 = arith.constant 0 : index
      %c0_33 = arith.constant 0 : index
      %54 = vector.load %arg11[%c0_32, %c0_33] : memref<16x128xf32, #tpu.memory_space<vmem>>, vector<16x128xf32>
      tpu.vector_store %arg11[%c0_32, %c0_33], %53 {strides = array<i32>} : memref<16x128xf32, #tpu.memory_space<vmem>>, vector<16x128xf32>,
    } else {
    }
    %c0 = arith.constant 0 : index
    %c0_1 = arith.constant 0 : index
    %3 = vector.load %arg10[%c0, %c0_1] : memref<16x128xf32, #tpu.memory_space<vmem>>, vector<16x128xf32>
    %c0_2 = arith.constant 0 : index
    %c0_3 = arith.constant 0 : index
    %4 = vector.load %arg5[%c0_2, %c0_3] : memref<128x256xf32, #tpu.memory_space<vmem>>, vector<128x256xf32>
    %cst = arith.constant dense<0.000000e+00> : vector<16x256xf32>
    %5 = tpu.matmul %3, %4, %cst {dimension_numbers = #tpu.dot_dimension_numbers<[1], [0], [0], [1], [0, 0, 1, 1], [], []>} : vector<16x128xf32>, vector<128x256xf32>, vector<16x256xf32> -> vector<16x256xf32>
    %c0_4 = arith.constant 0 : index
    %c0_5 = arith.constant 0 : index
    %6 = vector.load %arg6[%c0_4, %c0_5] : memref<1x256xf32, #tpu.memory_space<vmem>>, vector<1x256xf32>
    %7 = vector.broadcast %6 : vector<1x256xf32> to vector<16x256xf32>
    %8 = arith.addf %5, %7 : vector<16x256xf32>
    %cst_6 = arith.constant 5.000000e-01 : f32
    %9 = vector.broadcast %cst_6 : f32 to vector<16x256xf32>
    %10 = arith.mulf %9, %8 : vector<16x256xf32>
    %cst_7 = arith.constant 0.707106769 : f32
    %11 = vector.broadcast %cst_7 : f32 to vector<16x256xf32>
    %12 = arith.mulf %8, %11 : vector<16x256xf32>
    %13 = math.erf %12 : vector<16x256xf32>
    %cst_8 = arith.constant 1.000000e+00 : f32
    %14 = vector.broadcast %cst_8 : f32 to vector<16x256xf32>
    %15 = arith.addf %14, %13 : vector<16x256xf32>
    %16 = arith.mulf %10, %15 : vector<16x256xf32>
    %c0_9 = arith.constant 0 : index
    %c0_10 = arith.constant 0 : index
    %17 = vector.load %arg11[%c0_9, %c0_10] : memref<16x128xf32, #tpu.memory_space<vmem>>, vector<16x128xf32>
    %c0_11 = arith.constant 0 : index
    %c0_12 = arith.constant 0 : index
    %18 = vector.load %arg7[%c0_11, %c0_12] : memref<256x128xf32, #tpu.memory_space<vmem>>, vector<256x128xf32>
    %cst_13 = arith.constant dense<0.000000e+00> : vector<16x128xf32>
    %19 = tpu.matmul %16, %18, %cst_13 {dimension_numbers = #tpu.dot_dimension_numbers<[1], [0], [0], [1], [0, 0, 1, 1], [], []>} : vector<16x256xf32>, vector<256x128xf32>, vector<16x128xf32> -> vector<16x128xf32>
    %20 = arith.addf %17, %19 : vector<16x128xf32>
    %c0_14 = arith.constant 0 : index
    %c0_15 = arith.constant 0 : index
    %21 = vector.load %arg11[%c0_14, %c0_15] : memref<16x128xf32, #tpu.memory_space<vmem>>, vector<16x128xf32>
    tpu.vector_store %arg11[%c0_14, %c0_15], %20 {strides = array<i32>} : memref<16x128xf32, #tpu.memory_space<vmem>>, vector<16x128xf32>,
    %c1_i32 = arith.constant 1 : i32
    %22 = arith.cmpi eq, %arg1, %c1_i32 : i32
    %23 = arith.extui %22 : i1 to i32
    %c0_i32_16 = arith.constant 0 : i32
    %24 = arith.cmpi ne, %23, %c0_i32_16 : i32
    scf.if %24 {
      %c0_17 = arith.constant 0 : index
      %c0_18 = arith.constant 0 : index
      %25 = vector.load %arg11[%c0_17, %c0_18] : memref<16x128xf32, #tpu.memory_space<vmem>>, vector<16x128xf32>
      %c0_19 = arith.constant 0 : index
      %c0_20 = arith.constant 0 : index
      %26 = vector.load %arg9[%c0_19, %c0_20] : memref<16x128xf32, #tpu.memory_space<vmem>>, vector<16x128xf32>
      tpu.vector_store %arg9[%c0_19, %c0_20], %25 {strides = array<i32>} : memref<16x128xf32, #tpu.memory_space<vmem>>, vector<16x128xf32>,
    } else {
    }
    return
  }
  func.func @transform_0(%arg0: i32, %arg1: i32) -> (i32, i32) {
    %c0_i32 = arith.constant 0 : i32
    %c0_i32_0 = arith.constant 0 : i32
    return %arg0, %c0_i32 : i32, i32
  }
  func.func @transform_1(%arg0: i32, %arg1: i32) -> (i32, i32) {
    %c0_i32 = arith.constant 0 : i32
    %c0_i32_0 = arith.constant 0 : i32
    %c0_i32_1 = arith.constant 0 : i32
    return %c0_i32, %c0_i32_0 : i32, i32
  }
  func.func @transform_2(%arg0: i32, %arg1: i32) -> (i32, i32) {
    %c0_i32 = arith.constant 0 : i32
    %c0_i32_0 = arith.constant 0 : i32
    %c0_i32_1 = arith.constant 0 : i32
    return %c0_i32, %c0_i32_0 : i32, i32
  }
  func.func @transform_3(%arg0: i32, %arg1: i32) -> (i32, i32) {
    %c0_i32 = arith.constant 0 : i32
    %c0_i32_0 = arith.constant 0 : i32
    return %c0_i32, %arg1 : i32, i32
  }
  func.func @transform_4(%arg0: i32, %arg1: i32) -> (i32, i32) {
    %c0_i32 = arith.constant 0 : i32
    %c0_i32_0 = arith.constant 0 : i32
    return %c0_i32, %arg1 : i32, i32
  }
  func.func @transform_5(%arg0: i32, %arg1: i32) -> (i32, i32) {
    %c0_i32 = arith.constant 0 : i32
    %c0_i32_0 = arith.constant 0 : i32
    return %arg1, %c0_i32 : i32, i32
  }
  func.func @transform_6(%arg0: i32, %arg1: i32) -> (i32, i32) {
    %c0_i32 = arith.constant 0 : i32
    %c0_i32_0 = arith.constant 0 : i32
    %c0_i32_1 = arith.constant 0 : i32
    return %c0_i32, %c0_i32_0 : i32, i32
  }
  func.func @transform_7(%arg0: i32, %arg1: i32) -> (i32, i32) {
    %c0_i32 = arith.constant 0 : i32
    %c0_i32_0 = arith.constant 0 : i32
    return %arg0, %c0_i32 : i32, i32
  }
}

</mosaic_0001>

<bundles_post_ra>
// kernel: tpu_custom_call.1
= control target key start
LH: loop header
LB: loop body
LE: loop exit
PB: predicated region body
PF: predicated region fallthrough
CT: control target
= control target key end

     0   :  { %s2012_s0 = inlined_call_operand.hbm [shape: f32[32,128], index: 0, kind: input, shape index: {}]   ;;  %s2013_s1 = inlined_call_operand.hbm [shape: f32[1,128], index: 1, kind: input, shape index: {}]   ;;  %s2014_s2 = inlined_call_operand.vmem [shape: f32[1,128], index: 2, kind: input, shape index: {}]   ;;  %s2015_s3 = inlined_call_operand.hbm [shape: f32[128,512], index: 3, kind: input, shape index: {}]   ;;  %s2016_s4 = inlined_call_operand.hbm [shape: f32[1,512], index: 4, kind: input, shape index: {}]   ;;  %s2017_s5 = inlined_call_operand.hbm [shape: f32[512,128], index: 5, kind: input, shape index: {}]   ;;  %s2018_s6 = inlined_call_operand.vmem [shape: f32[1,128], index: 6, kind: input, shape index: {}]   ;;  %s2019_s7 = inlined_call_operand.hbm [shape: f32[32,128], index: 7, kind: output, shape index: {}]  }
   0x1   :  { %2026 = sst [smem:[#allocation23_spill]] %s2012_s0 }
   0x2   :  { %2027 = sst [smem:[#allocation24_spill]] %s2013_s1 }
   0x3   :  { %2028 = sst [smem:[#allocation25_spill]] %s2014_s2 }
   0x4   :  { %2029 = sst [smem:[#allocation26_spill]] %s2015_s3 }
   0x5   :  { %2030 = sst [smem:[#allocation27_spill]] %s2016_s4 }
   0x6   :  { %2031 = sst [smem:[#allocation28_spill]] %s2019_s7 }
   0x7   :  { %12 = vsyncpa [#allocation5], 0 }
   0x8   :  { %14 = vsyncpa [#allocation5 + $0x1], 0 }
   0x9   :  { %15 = vsyncpa [#allocation8], 0 }
   0xa   :  { %16 = vsyncpa [#allocation6], 0 }
   0xb   :  { %18 = vsyncpa [#allocation6 + $0x1], 0  ;;  %s1566_s24 = smov 0   ;;  %s1568_s25 = smov 0  }
   0xc   :  { %s1570_s26 = smov 0   ;;  %s1572_s27 = smov 0  }
   0xd   :  { %s1574_s28 = smov 0   ;;  %s1576_s29 = smov 0  }
   0xe   :  { %s1578_s30 = smov 0   ;;  %s1580_s8 = smov 0  }
   0xf   :  { %s1582_s9 = smov 0   ;;  %s1584_s10 = smov 0  }
  0x10   :  { %s1586_s11 = smov 0  }
  0x11 LB: > { %2032 = sst [smem:[#allocation17_spill]] %s1503_s8  ;;  %s33_s12 = sadd.s32 1, %s1507_s9  ;;  %s1515_s11 = sphi %s1586_s11, %s24_s11   ;;  %s1511_s10 = sphi %s1584_s10, %s2059_s10   ;;  %s1507_s9 = sphi %s1582_s9, %s2067_s9   ;;  %s1503_s8 = sphi %s1580_s8, %s2057_s8   ;;  %s1499_s30 = sphi %s1578_s30, %s2066_s30   ;;  %s1495_s29 = sphi %s1576_s29, %s2065_s29   ;;  %s1491_s28 = sphi %s1574_s28, %s2064_s28   ;;  %s1487_s27 = sphi %s1572_s27, %s2063_s27   ;;  %s1483_s26 = sphi %s1570_s26, %s2062_s26   ;;  %s1479_s25 = sphi %s1568_s25, %s2061_s25   ;;  %s1475_s24 = sphi %s1566_s24, %s2060_s24  }
  0x12   : > { %2033 = sst [smem:[#allocation18_spill]] %s1511_s10  ;;  %s36_s13 = sadd.s32 1, %s1511_s10 }
  0x13   : > { %p34_p0 = scmp.ge.s32.totalorder %s33_s12, 2  ;;  %s43_s14 = sadd.s32 1, %s1495_s29 }
  0x14   : > { %p50_p1 = scmp.ne.s32.totalorder %s1495_s29, %s1491_s28  ;;  %p51_p2 = scmp.eq.s32.totalorder %s1515_s11, 0 }
  0x15   : > { %s2069_s12 = smov (%p34_p0, %s33_s12), 0  ;;  %s2071_s13 = smov (!%p34_p0, %s36_s13), %s1511_s10 }
  0x16   : > { %2034 = sst [smem:[#allocation19_spill]] %s2069_s12  ;;  %p1633_p3 = por %p51_p2, %p50_p1 }
  0x17   : > { %s108_s16 = ssub.s32 %s1507_s9, %s2069_s12  ;;  %p38_p4 = scmp.ge.s32.totalorder %s2071_s13, 2 }
  0x18   : > { %p109_p5 = scmp.eq.s32.totalorder %s108_s16, 0  ;;  %s111_s17 = sadd.s32 1, %s1483_s26 }
  0x19   : > { %p118_p6 = scmp.ne.s32.totalorder %s1483_s26, %s1479_s25  ;;  %s2073_s13 = smov (%p38_p4, %s2071_s13), 0 }
  0x1a   : > { %2036 = sst [smem:[#allocation20_spill]] %s2073_s13  ;;  %s40_s19 = ssub.s32 %s1511_s10, %s2073_s13 }
  0x1b   : > { %s1645_s18 = scalar_select %p109_p5, %s1483_s26, %s111_s17  }
  0x1c   : > { %p1649_p7 = por %p118_p6, %p51_p2  ;;  %p41_p8 = scmp.eq.s32.totalorder %s40_s19, 0 }
  0x1d   : > { %2037 = sst [smem:[#allocation21_spill]] %s1645_s18  ;;  %p1118_p9 = scmp.lt.s32.totalorder %s1515_s11, 4 }
  0x1e   : > { %s265_s21 = sand.u32 1, %s1515_s11   ;;  %s267_s23 = sand.u32 1, %s1495_s29  }
  0x1f   : > { %s1656_s22 = scalar_select %p41_p8, %s1495_s29, %s43_s14  }
  0x20   : > { %s1049_s16 = sshll.u32 %s267_s23, 4  ;;  %s1078_s17 = sshll.u32 %s1511_s10, 4 }
  0x21   : > { %2039 = sst [smem:[#allocation22_spill]] %s1656_s22  ;;  %s269_s8 = scalar_lea.vmem [#allocation4], %s1049_s16 }
  0x22   : > { %s2040_s0 = sld [smem:[#allocation23_spill]]  ;;  %s277_s2 = sshll.u32 %s269_s8, 4  ;;  %s278_s2 = int_to_ptr.vmem [resolvable:$true] %s277_s2 }
  0x23   : > { %p1101_p10 = pnand %p1118_p9, %p1633_p3  ;;  %p1671_p11 = pnand %p1118_p9, %p1649_p7 }
  0x24   : > { %s289_s19 = sand.u32 1, %s1483_s26   ;;  %s1676_s23 = scalar_lea.sflag [#allocation5], %s265_s21 }
  0x25   : > { %s2023_s12 = smov 128   ;;  %s2024_s8 = smov 8  }
  0x26   : > { %s1079_s15 = sshll.u32 %s1507_s9, 4  ;;  %s2042_s3 = sld [smem:[#allocation26_spill]] }
  0x27   : > { %s1055_s18 = sshll.u32 %s289_s19, 1  ;;  %s2043_s4 = sld [smem:[#allocation27_spill]] }
  0x28   : > { %s274_s13 = scalar_lea.hbm %s2040_s0, %s1078_s17  ;;  %s1700_s22 = sadd.s32 4294967295, %s1515_s11  }
  0x29   : > { %s275_s7 = sshll.u32 %s274_s13, 4  ;;  %s1682_s13 = sshll.u32 %s289_s19, 8  ;;  %s276_s7 = int_to_ptr.hbm [resolvable:$true] %s275_s7 }
  0x2a   : > { %1103 = dma.hbm_to_vmem [thread:$0]  (!%p1101_p10), %s276_s7, 256, %s278_s2, %s1676_s23, %s2023_s12, %s2023_s12, %s2024_s8  }
  0x2b   : > { %s291_s17 = scalar_lea.vmem [#allocation9], %s1682_s13  ;;  %s1519_s2 = smov 512  }
  0x2c   : > { %s296_s16 = scalar_lea.hbm %s2042_s3, %s1079_s15  ;;  %s299_s21 = sshll.u32 %s291_s17, 4  ;;  %s300_s21 = int_to_ptr.vmem [resolvable:$true] %s299_s21 }
  0x2d   : > { %s297_s0 = sshll.u32 %s296_s16, 4  ;;  %s1520_s7 = smov 256   ;;  %s298_s0 = int_to_ptr.hbm [resolvable:$true] %s297_s0 }
  0x2e   : > { %s1521_s12 = smov 16   ;;  %s1056_s15 = sshll.u32 %s1507_s9, 1 }
  0x2f   : > { %1106 = dma.hbm_to_vmem [thread:$0]  (!%p1671_p11), %s298_s0, 4096, %s300_s21, %s1676_s23, %s1519_s2, %s1520_s7, %s1521_s12  }
  0x30   : > { %s317_s8 = scalar_lea.hbm %s2043_s4, %s1056_s15  ;;  %s313_s3 = scalar_lea.vmem [#allocation10], %s1055_s18 }
  0x31   : > { %s319_s16 = sshll.u32 %s317_s8, 4  ;;  %s321_s10 = sshll.u32 %s313_s3, 4  ;;  %s320_s16 = int_to_ptr.hbm [resolvable:$true] %s319_s16  ;;  %s322_s10 = int_to_ptr.vmem [resolvable:$true] %s321_s10 }
  0x32   : > { %1109 = dma.hbm_to_vmem [thread:$0]  (!%p1671_p11), %s320_s16, 32, %s322_s10, %s1676_s23  }
  0x33   : > { %s1045_s0 = sadd.s32 4294967294, %s1515_s11   ;;  %p56_p12 = scmp.ne.s32.totalorder %s1491_s28, %s1487_s27 }
  0x34   : > { %p57_p13 = scmp.eq.s32.totalorder %s1700_s22, 0  ;;  %p124_p0 = scmp.ne.s32.totalorder %s1479_s25, %s1475_s24 }
  0x35   : > { %p221_p2 = scmp.eq.s32.totalorder %s1700_s22, 3  ;;  %p227_p4 = scmp.eq.s32.totalorder %s1045_s0, 3 }
  0x36   : > { %p1711_p3 = por %p57_p13, %p56_p12  ;;  %p1717_p5 = por %p124_p0, %p57_p13 }
  0x37   : > { %p1724_p6 = por %p221_p2, %p50_p1  ;;  %p1728_p7 = por %p227_p4, %p56_p12 }
  0x38   : > { %p1046_p8 = scmp.ge.s32.totalorder %s1515_s11, 1  ;;  %p234_p9 = scmp.lt.s32.totalorder %s1515_s11, 5 }
  0x39   : > { %s2048_s1 = sld [smem:[#allocation24_spill]]  ;;  %s1522_s7 = smov [#allocation7]  }
  0x3a   : > { %p1737_p10 = pnand %p1046_p8, %p234_p9  ;;  %s248_s18 = sshll.u32 %s1522_s7, 4  ;;  %s249_s18 = int_to_ptr.vmem [resolvable:$true] %s248_s18 }
  0x3b   : > { %s1080_s15 = sshll.u32 %s1507_s9, 8  ;;  %s332_s20 = scalar_lea.vmem [#allocation11], %s1682_s13 }
  0x3c   : > { %p1096_p1 = pneg %p1737_p10  ;;  %s340_s17 = sshll.u32 %s332_s20, 4  ;;  %s341_s17 = int_to_ptr.vmem [resolvable:$true] %s340_s17 }
  0x3d   : > { %s337_s12 = scalar_lea.hbm %s2017_s5, %s1080_s15  ;;  %s2051_s4 = smov 128  }
  0x3e   : > { %p1097_p12 = pnand %p1096_p1, %p57_p13  ;;  %s338_s8 = sshll.u32 %s337_s12, 4  ;;  %s339_s8 = int_to_ptr.hbm [resolvable:$true] %s338_s8 }
  0x3f   : > { %s246_s21 = sshll.u32 %s2048_s1, 4  ;;  %s2050_s1 = smov 8   ;;  %s247_s21 = int_to_ptr.hbm [resolvable:$true] %s246_s21 }
  0x40   : > { %1099 = dma.hbm_to_vmem [thread:$0]  (!%p1097_p12), %s247_s21, 16, %s249_s18, [#allocation8]  }
  0x41   : > { %1112 = dma.hbm_to_vmem [thread:$0]  (!%p1671_p11), %s339_s8, 4096, %s341_s17, %s1676_s23, %s2051_s4, %s2051_s4, %s2050_s1  }
  0x42   : > { %352 = sbr.rel (%p1737_p10) target bundleno = 752 (0x2f0), region = 48  ;;  %s354_s13 = sand.u32 (!%p1737_p10), 1, %s1700_s22  }
  0x43   : > { %s356_s7 = sand.u32 (!%p1737_p10), 1, %s1491_s28   ;;  %s355_s20 = scalar_lea.sflag (!%p1737_p10), [#allocation5], %s354_s13 }
  0x44   : > { %s1061_s15 = sshll.u32 (!%p1737_p10), %s356_s7, 4 }
  0x45   : > { %s358_s16 = scalar_lea.vmem (!%p1737_p10), [#allocation4], %s1061_s15 }
  0x47   : > { %1458 = dma.done.wait (%p1711_p3), %s355_s20, 256  }
  0x48   : > { %1460 = vsyncadd (%p1711_p3), %s355_s20, 4294967040 }
  0x49   : > { %1462 = dma.done.wait (%p57_p13), [#allocation8], 16  }
  0x4a   : > { %1464 = vsyncadd (%p57_p13), [#allocation8], 4294967280  ;;  %s371_s1 = sand.u32 1, %s1479_s25  }
  0x4b   : > { %s1063_s4 = sshll.u32 %s371_s1, 8 }
  0x4c   : > { %s1771_s14 = scalar_lea.vmem [#allocation9], %s1063_s4 }
  0x4d   : > { %1466 = dma.done.wait (%p1717_p5), %s355_s20, 8224  }
  0x4e   : > { %1468 = vsyncadd (%p1717_p5), %s355_s20, 4294959072  ;;  %s1777_s23 = sshll.u32 %s371_s1, 1  ;;  %s1780_s21 = scalar_lea.vmem [#allocation11], %s1063_s4 }
  0x4f   : > { %s383_s3 = scalar_lea.vmem [#allocation10], %s1777_s23  ;;  %s1782_s2 = scalar_lea.vmem [#allocation12], %s1061_s15 }
  0x50   : > { %p1067_p11 = scmp.ne.s32.totalorder %s1499_s30, 0 }
  0x51   : > { %s2052_s0 = sld [smem:[#allocation25_spill]] (!%p1067_p11) }
  0x52   : > { %448 = sbr.rel (%p1067_p11) target bundleno = 363 (0x16b), region = 72 }
  0x57   : > { %v449_v0 = vld [vmem:[%s358_s16] sm:$0xff]  ;;  %v450_v2 = vld [vmem:[%s358_s16 + $0x8] sm:$0xff]  ;;  %v1523_v5 = vmov 128.0  }
  0x58   : > { %v1218_v1 = vld [vmem:[%s2018_s6] ss:$0 sm:$0xff]  ;;  %451 = vadd.xlane.f32.xlu0 %v449_v0  ;;  %1221 = vrcp.f32 %v1523_v5 }
  0x59   : > { %v516_v3 = vadd.f32 %v1218_v1, %v449_v0  ;;  %v517_v4 = vadd.f32 %v1218_v1, %v450_v2  ;;  %v1219_v34 = vld [vmem:[#allocation7] ss:$0 sm:$0xff] }
  0x5a   : > { %v1220_v37 = vld [vmem:[%s2052_s0] ss:$0 sm:$0xff] }
  0x5b   : > { %518 = vst [vmem:[#allocation3 + $0x8] sm:$0xff] %v516_v3 }
  0x5c   : > { %519 = vst [vmem:[#allocation3] sm:$0xff] %v517_v4 }
  0x5e   : > { %v1222_v6 = vpop.eup %1221 }
  0x5f   : > { %v456_v7 = vmul.f32 128.0, %v1222_v6  ;;  %vm460_vm0 = vweird.f32 %v1222_v6 }
  0x60   : > { %453 = vadd.xlane.f32.xlu0 %v450_v2 }
  0x61   : > { %v457_v8 = vsub.f32 1.0, %v456_v7 }
  0x63   : > { %v458_v9 = vmul.f32 %v1222_v6, %v457_v8 }
  0x65   : > { %v459_v10 = vadd.f32 %v1222_v6, %v458_v9 }
  0x67   : > { %v461_v11 = vsel %vm460_vm0, %v1222_v6, %v459_v10 }
  0xcb   : > { %v452_v12 = vpop.xlane.xlu0 %451 }
  0xcc   : > { %v462_v13 = vmul.f32 %v461_v11, %v452_v12 }
  0xce   : > { %v464_v14 = vsub.f32 %v449_v0, %v462_v13 }
  0xd0   : > { %v466_v15 = vmul.f32 %v464_v14, %v464_v14 }
  0xd2   : > { %468 = vadd.xlane.f32.xlu1 %v466_v15 }
  0xd3   : > { %v454_v16 = vpop.xlane.xlu0 %453 }
  0xd4   : > { %v463_v17 = vmul.f32 %v461_v11, %v454_v16 }
  0xd6   : > { %v465_v18 = vsub.f32 %v450_v2, %v463_v17 }
  0xd8   : > { %v467_v19 = vmul.f32 %v465_v18, %v465_v18 }
  0xda   : > { %470 = vadd.xlane.f32.xlu1 %v467_v19 }
 0x145   : > { %v469_v20 = vpop.xlane.xlu1 %468 }
 0x146   : > { %v472_v21 = vmul.f32 %v469_v20, %v461_v11 }
 0x148   : > { %v474_v22 = vadd.f32 1e-05, %v472_v21 }
 0x14a   : > { %1223 = vrsqrt.f32 %v474_v22  ;;  %vm482_vm2 = vweird.f32 %v474_v22 }
 0x14d   : > { %v471_v23 = vpop.xlane.xlu1 %470 }
 0x14e   : > { %v473_v24 = vmul.f32 %v471_v23, %v461_v11 }
 0x150   : > { %v1224_v25 = vpop.eup %1223  ;;  %v475_v26 = vadd.f32 1e-05, %v473_v24 }
 0x151   : > { %v477_v27 = vmul.f32 %v1224_v25, %v474_v22  ;;  %vm483_vm1 = vweird.f32 %v1224_v25 }
 0x152   : > { %1225 = vrsqrt.f32 %v475_v26  ;;  %vm484_vm3 = vmor %vm482_vm2, %vm483_vm1  ;;  %vm492_vm5 = vweird.f32 %v475_v26 }
 0x153   : > { %v478_v28 = vmul.f32 %v1224_v25, %v477_v27 }
 0x155   : > { %v479_v29 = vmul.f32 0.5, %v478_v28 }
 0x157   : > { %v480_v30 = vsub.f32 1.5, %v479_v29 }
 0x158   : > { %v1226_v31 = vpop.eup %1225 }
 0x159   : > { %v481_v32 = vmul.f32 %v1224_v25, %v480_v30  ;;  %v487_v33 = vmul.f32 %v1226_v31, %v475_v26  ;;  %vm493_vm4 = vweird.f32 %v1226_v31 }
 0x15a   : > { %vm494_vm6 = vmor %vm492_vm5, %vm493_vm4 }
 0x15b   : > { %v485_v35 = vsel %vm484_vm3, %v1224_v25, %v481_v32  ;;  %v488_v36 = vmul.f32 %v1226_v31, %v487_v33 }
 0x15c   : > { %v496_v38 = vmul.f32 %v485_v35, %v464_v14 }
 0x15d   : > { %v489_v39 = vmul.f32 0.5, %v488_v36 }
 0x15e   : > { %v502_v40 = vmul.f32 %v1219_v34, %v496_v38 }
 0x15f   : > { %v490_v41 = vsub.f32 1.5, %v489_v39 }
 0x160   : > { %v508_v42 = vadd.f32 %v1220_v37, %v502_v40 }
 0x161   : > { %v491_v43 = vmul.f32 %v1226_v31, %v490_v41 }
 0x162   : > { %510 = vst [vmem:[#allocation2] sm:$0xff] %v508_v42 }
 0x163   : > { %v495_v44 = vsel %vm494_vm6, %v1226_v31, %v491_v43 }
 0x164   : > { %v497_v45 = vmul.f32 %v495_v44, %v465_v18 }
 0x166   : > { %v503_v46 = vmul.f32 %v1219_v34, %v497_v45 }
 0x168   : > { %v509_v47 = vadd.f32 %v1220_v37, %v503_v46 }
 0x16a   : > { %511 = vst [vmem:[#allocation2 + $0x8] sm:$0xff] %v509_v47 }
 0x16b PF: > { %v552_v48 = vld [vmem:[%s1771_s14 + $0xf0] sm:$0xff]  ;;  %v553_v49 = vld [vmem:[%s1771_s14 + $0xf8] sm:$0xff]  ;;  %v550_v50 = vld [vmem:[%s1771_s14 + $0xe0] sm:$0xff]  ;;  %p1072_p13 = scmp.ne.s32.totalorder %s1499_s30, 1 }
 0x16c   : > { %560 = vmatpush.msra.mxu0 %v552_v48  ;;  %583 = vmatpush.msra.mxu1 %v553_v49  ;;  %v551_v51 = vld [vmem:[%s1771_s14 + $0xe8] sm:$0xff]  ;;  %v548_v52 = vld [vmem:[%s1771_s14 + $0xd0] sm:$0xff]  ;;  %v549_v53 = vld [vmem:[%s1771_s14 + $0xd8] sm:$0xff] }
 0x16d   : > { %v546_v54 = vld [vmem:[%s1771_s14 + $0xc0] sm:$0xff]  ;;  %v547_v55 = vld [vmem:[%s1771_s14 + $0xc8] sm:$0xff]  ;;  %v544_v56 = vld [vmem:[%s1771_s14 + $0xb0] sm:$0xff] }
 0x16e   : > { %561 = vmatpush.msra.mxu0 %v550_v50  ;;  %584 = vmatpush.msra.mxu1 %v551_v51  ;;  %v545_v57 = vld [vmem:[%s1771_s14 + $0xb8] sm:$0xff]  ;;  %v542_v58 = vld [vmem:[%s1771_s14 + $0xa0] sm:$0xff]  ;;  %v543_v59 = vld [vmem:[%s1771_s14 + $0xa8] sm:$0xff] }
 0x16f   : > { %v540_v60 = vld [vmem:[%s1771_s14 + $0x90] sm:$0xff]  ;;  %v541_v61 = vld [vmem:[%s1771_s14 + $0x98] sm:$0xff]  ;;  %v538_v62 = vld [vmem:[%s1771_s14 + $0x80] sm:$0xff] }
 0x170   : > { %562 = vmatpush.msra.mxu0 %v548_v52  ;;  %585 = vmatpush.msra.mxu1 %v549_v53  ;;  %v539_v63 = vld [vmem:[%s1771_s14 + $0x88] sm:$0xff]  ;;  %v536_v0 = vld [vmem:[%s1771_s14 + $0x70] sm:$0xff]  ;;  %v537_v1 = vld [vmem:[%s1771_s14 + $0x78] sm:$0xff] }
 0x171   : > { %v534_v2 = vld [vmem:[%s1771_s14 + $0x60] sm:$0xff]  ;;  %v535_v3 = vld [vmem:[%s1771_s14 + $0x68] sm:$0xff]  ;;  %v532_v4 = vld [vmem:[%s1771_s14 + $0x50] sm:$0xff] }
 0x172   : > { %563 = vmatpush.msra.mxu0 %v546_v54  ;;  %586 = vmatpush.msra.mxu1 %v547_v55  ;;  %v533_v5 = vld [vmem:[%s1771_s14 + $0x58] sm:$0xff]  ;;  %v530_v6 = vld [vmem:[%s1771_s14 + $0x40] sm:$0xff]  ;;  %v531_v7 = vld [vmem:[%s1771_s14 + $0x48] sm:$0xff] }
 0x173   : > { %v528_v8 = vld [vmem:[%s1771_s14 + $0x30] sm:$0xff]  ;;  %v529_v9 = vld [vmem:[%s1771_s14 + $0x38] sm:$0xff]  ;;  %v526_v10 = vld [vmem:[%s1771_s14 + $0x20] sm:$0xff] }
 0x174   : > { %564 = vmatpush.msra.mxu0 %v544_v56  ;;  %587 = vmatpush.msra.mxu1 %v545_v57  ;;  %v527_v11 = vld [vmem:[%s1771_s14 + $0x28] sm:$0xff]  ;;  %v524_v12 = vld [vmem:[%s1771_s14 + $0x10] sm:$0xff]  ;;  %v525_v13 = vld [vmem:[%s1771_s14 + $0x18] sm:$0xff] }
 0x175   : > { %v522_v14 = vld [vmem:[%s1771_s14] sm:$0xff]  ;;  %v523_v15 = vld [vmem:[%s1771_s14 + $0x8] sm:$0xff]  ;;  %v798_v20 = vld [vmem:[%s1780_s21 + $0x70] sm:$0xff] }
 0x176   : > { %565 = vmatpush.msra.mxu0 %v542_v58  ;;  %588 = vmatpush.msra.mxu1 %v543_v59  ;;  %v520_v16 = vld [vmem:[#allocation2] sm:$0xff]  ;;  %v521_v17 = vld [vmem:[#allocation2 + $0x8] sm:$0xff]  ;;  %v814_v21 = vld [vmem:[%s1780_s21 + $0xf0] sm:$0xff] }
 0x177   : > { %v799_v18 = vld [vmem:[%s1780_s21 + $0x78] sm:$0xff]  ;;  %v797_v23 = vld [vmem:[%s1780_s21 + $0x68] sm:$0xff]  ;;  %v796_v27 = vld [vmem:[%s1780_s21 + $0x60] sm:$0xff] }
 0x178   : > { %566 = vmatpush.msra.mxu0 %v540_v60  ;;  %589 = vmatpush.msra.mxu1 %v541_v61  ;;  %v815_v19 = vld [vmem:[%s1780_s21 + $0xf8] sm:$0xff]  ;;  %v813_v24 = vld [vmem:[%s1780_s21 + $0xe8] sm:$0xff]  ;;  %v812_v28 = vld [vmem:[%s1780_s21 + $0xe0] sm:$0xff] }
 0x179   : > { %816 = vmatpush.msra.mxu2 %v799_v18  ;;  %839 = vmatpush.msra.mxu3 %v815_v19  ;;  %v554_v22 = vld [vmem:[%s383_s3] sm:$0x3]  ;;  %v794_v35 = vld [vmem:[%s1780_s21 + $0x50] sm:$0xff]  ;;  %v793_v39 = vld [vmem:[%s1780_s21 + $0x48] sm:$0xff] }
 0x17a   : > { %567 = vmatpush.msra.mxu0 %v538_v62  ;;  %590 = vmatpush.msra.mxu1 %v539_v63  ;;  %v556_v25 = vperm.slane %v554_v22, 0  ;;  %v557_v26 = vperm.slane %v554_v22, 1  ;;  %v795_v29 = vld [vmem:[%s1780_s21 + $0x58] sm:$0xff]  ;;  %v810_v36 = vld [vmem:[%s1780_s21 + $0xd0] sm:$0xff]  ;;  %v809_v40 = vld [vmem:[%s1780_s21 + $0xc8] sm:$0xff] }
 0x17b   : > { %817 = vmatpush.msra.mxu2 %v798_v20  ;;  %840 = vmatpush.msra.mxu3 %v814_v21  ;;  %v811_v30 = vld [vmem:[%s1780_s21 + $0xd8] sm:$0xff]  ;;  %v792_v43 = vld [vmem:[%s1780_s21 + $0x40] sm:$0xff]  ;;  %v790_v51 = vld [vmem:[%s1780_s21 + $0x30] sm:$0xff] }
 0x17c   : > { %568 = vmatpush.msra.mxu0 %v536_v0  ;;  %591 = vmatpush.msra.mxu1 %v537_v1  ;;  %v808_v44 = vld [vmem:[%s1780_s21 + $0xc0] sm:$0xff]  ;;  %v791_v45 = vld [vmem:[%s1780_s21 + $0x38] sm:$0xff]  ;;  %v806_v52 = vld [vmem:[%s1780_s21 + $0xb0] sm:$0xff] }
 0x17d   : > { %818 = vmatpush.msra.mxu2 %v797_v23  ;;  %841 = vmatpush.msra.mxu3 %v813_v24  ;;  %v807_v46 = vld [vmem:[%s1780_s21 + $0xb8] sm:$0xff]  ;;  %v789_v57 = vld [vmem:[%s1780_s21 + $0x28] sm:$0xff]  ;;  %v788_v0 = vld [vmem:[%s1780_s21 + $0x20] sm:$0xff] }
 0x17e   : > { %569 = vmatpush.msra.mxu0 %v534_v2  ;;  %592 = vmatpush.msra.mxu1 %v535_v3  ;;  %v805_v58 = vld [vmem:[%s1780_s21 + $0xa8] sm:$0xff]  ;;  %v804_v1 = vld [vmem:[%s1780_s21 + $0xa0] sm:$0xff] }
 0x17f   : > { %819 = vmatpush.msra.mxu2 %v796_v27  ;;  %842 = vmatpush.msra.mxu3 %v812_v28  ;;  %v785_v22 = vld [vmem:[%s1780_s21 + $0x8] sm:$0xff] }
 0x180   : > { %570 = vmatpush.msra.mxu0 %v532_v4  ;;  %593 = vmatpush.msra.mxu1 %v533_v5  ;;  %v801_v23 = vld [vmem:[%s1780_s21 + $0x88] sm:$0xff] }
 0x181   : > { %820 = vmatpush.msra.mxu2 %v795_v29  ;;  %843 = vmatpush.msra.mxu3 %v811_v30  ;;  %v784_v30 = vld [vmem:[%s1780_s21] sm:$0xff] }
 0x182   : > { %571 = vmatpush.msra.mxu0 %v530_v6  ;;  %594 = vmatpush.msra.mxu1 %v531_v7 }
 0x183   : > { %821 = vmatpush.msra.mxu2 %v794_v35  ;;  %844 = vmatpush.msra.mxu3 %v810_v36 }
 0x184   : > { %572 = vmatpush.msra.mxu0 %v528_v8  ;;  %595 = vmatpush.msra.mxu1 %v529_v9  ;;  %v787_v8 = vld [vmem:[%s1780_s21 + $0x18] sm:$0xff] }
 0x185   : > { %822 = vmatpush.msra.mxu2 %v793_v39  ;;  %845 = vmatpush.msra.mxu3 %v809_v40  ;;  %v803_v9 = vld [vmem:[%s1780_s21 + $0x98] sm:$0xff] }
 0x186   : > { %573 = vmatpush.msra.mxu0 %v526_v10  ;;  %596 = vmatpush.msra.mxu1 %v527_v11 }
 0x187   : > { %823 = vmatpush.msra.mxu2 %v792_v43  ;;  %846 = vmatpush.msra.mxu3 %v808_v44 }
 0x188   : > { %574 = vmatpush.msra.mxu0 %v524_v12  ;;  %597 = vmatpush.msra.mxu1 %v525_v13 }
 0x189   : > { %824 = vmatpush.msra.mxu2 %v791_v45  ;;  %847 = vmatpush.msra.mxu3 %v807_v46 }
 0x18a   : > { %575 = vmatpush.msra.mxu0 %v522_v14  ;;  %598 = vmatpush.msra.mxu1 %v523_v15 }
 0x18b   : > { %576 = vmatmul.f32.vlgmr.msra.gmra.mxu0 %v520_v16  ;;  %599 = vmatmul.f32.vlgmr.msra.gmra.mxu1 %v520_v16  ;;  %v786_v16 = vld [vmem:[%s1780_s21 + $0x10] sm:$0xff] }
 0x18c   : > { %825 = vmatpush.msra.mxu2 %v790_v51  ;;  %848 = vmatpush.msra.mxu3 %v806_v52 }
 0x18e   : > { %826 = vmatpush.msra.mxu2 %v789_v57  ;;  %849 = vmatpush.msra.mxu3 %v805_v58 }
 0x190   : > { %827 = vmatpush.msra.mxu2 %v788_v0  ;;  %850 = vmatpush.msra.mxu3 %v804_v1 }
 0x192   : > { %828 = vmatpush.msra.mxu2 %v787_v8  ;;  %851 = vmatpush.msra.mxu3 %v803_v9 }
 0x193   : > { %579 = vmatmul.f32.gmra.mxu0 %v521_v17  ;;  %602 = vmatmul.f32.gmra.mxu1 %v521_v17  ;;  %v802_v17 = vld [vmem:[%s1780_s21 + $0x90] sm:$0xff] }
 0x194   : > { %829 = vmatpush.msra.mxu2 %v786_v16  ;;  %852 = vmatpush.msra.mxu3 %v802_v17 }
 0x196   : > { %830 = vmatpush.msra.mxu2 %v785_v22  ;;  %853 = vmatpush.msra.mxu3 %v801_v23 }
 0x198   : > { %831 = vmatpush.msra.mxu2 %v784_v30 }
 0x208   : > { %v577_v31 = vpop.f32.mrf.mxu0  ;;  %v600_v32 = vpop.f32.mrf.mxu1 }
 0x209   : > { %v1835_v33 = vadd.f32 %v577_v31, %v556_v25  ;;  %v1837_v34 = vadd.f32 %v600_v32, %v557_v26  ;;  %v800_v31 = vld [vmem:[%s1780_s21 + $0x80] sm:$0xff] }
 0x20a   : > { %854 = vmatpush.msra.mxu3 %v800_v31 }
 0x20b   : > { %v1842_v37 = vmul.f32 0.70710677, %v1835_v33  ;;  %v1845_v38 = vmul.f32 0.70710677, %v1837_v34 }
 0x20d   : > { %v614_v41 = vmul.f32 %v1842_v37, %v1842_v37  ;;  %v654_v42 = vmul.f32 %v1845_v38, %v1845_v38 }
 0x20f   : > { %v1857_v47 = vmin.f32 %v614_v41, 16.0  ;;  %v1859_v48 = vmin.f32 %v654_v42, 16.0 }
 0x210   : > { %v580_v49 = vpop.f32.mrf.mxu0  ;;  %v603_v50 = vpop.f32.mrf.mxu1 }
 0x211   : > { %v616_v53 = vmul.f32 2.1237322e-06, %v1857_v47  ;;  %v656_v54 = vmul.f32 2.1237322e-06, %v1859_v48  ;;  %v1865_v55 = vadd.f32 %v580_v49, %v556_v25  ;;  %v1867_v56 = vadd.f32 %v603_v50, %v557_v26 }
 0x212   : > { %v627_v59 = vmul.f32 3.8918573e-05, %v1857_v47  ;;  %v667_v5 = vmul.f32 3.8918573e-05, %v1859_v48 }
 0x213   : > { %v617_v60 = vadd.f32 0.00028619796, %v616_v53  ;;  %v657_v61 = vadd.f32 0.00028619796, %v656_v54  ;;  %v1873_v62 = vmul.f32 0.70710677, %v1865_v55 }
 0x214   : > { %v1876_v63 = vmul.f32 0.70710677, %v1867_v56  ;;  %v628_v4 = vadd.f32 0.001143296, %v627_v59  ;;  %v668_v13 = vadd.f32 0.001143296, %v667_v5 }
 0x215   : > { %v618_v2 = vmul.f32 %v617_v60, %v1857_v47  ;;  %v658_v3 = vmul.f32 %v657_v61, %v1859_v48  ;;  %v694_v6 = vmul.f32 %v1873_v62, %v1873_v62 }
 0x216   : > { %v734_v7 = vmul.f32 %v1876_v63, %v1876_v63  ;;  %v629_v12 = vmul.f32 %v628_v4, %v1857_v47  ;;  %v669_v20 = vmul.f32 %v668_v13, %v1859_v48 }
 0x217   : > { %v619_v10 = vadd.f32 0.0036580483, %v618_v2  ;;  %v659_v11 = vadd.f32 0.0036580483, %v658_v3  ;;  %v1890_v14 = vmin.f32 %v694_v6, 16.0 }
 0x218   : > { %v1892_v15 = vmin.f32 %v734_v7, 16.0  ;;  %v630_v19 = vadd.f32 0.014752088, %v629_v12  ;;  %v670_v28 = vadd.f32 0.014752088, %v669_v20 }
 0x219   : > { %v620_v18 = vmul.f32 %v619_v10, %v1857_v47  ;;  %v696_v21 = vmul.f32 2.1237322e-06, %v1890_v14  ;;  %v707_v24 = vmul.f32 3.8918573e-05, %v1890_v14  ;;  %v660_v25 = vmul.f32 %v659_v11, %v1859_v48 }
 0x21a   : > { %v736_v26 = vmul.f32 2.1237322e-06, %v1892_v15  ;;  %v631_v27 = vmul.f32 %v630_v19, %v1857_v47  ;;  %v671_v39 = vmul.f32 %v670_v28, %v1859_v48  ;;  %v747_v42 = vmul.f32 3.8918573e-05, %v1892_v15 }
 0x21b   : > { %v697_v29 = vadd.f32 0.00028619796, %v696_v21  ;;  %v708_v32 = vadd.f32 0.001143296, %v707_v24  ;;  %v621_v35 = vadd.f32 0.05243302, %v620_v18 }
 0x21c   : > { %v632_v36 = vadd.f32 0.112945676, %v631_v27  ;;  %v661_v43 = vadd.f32 0.05243302, %v660_v25  ;;  %v737_v44 = vadd.f32 0.00028619796, %v736_v26 }
 0x21d   : > { %v698_v40 = vmul.f32 %v697_v29, %v1890_v14  ;;  %v709_v41 = vmul.f32 %v708_v32, %v1890_v14  ;;  %v672_v46 = vadd.f32 0.112945676, %v671_v39  ;;  %v622_v51 = vmul.f32 %v621_v35, %v1857_v47 }
 0x21e   : > { %v633_v45 = vmul.f32 %v632_v36, %v1857_v47  ;;  %v748_v57 = vadd.f32 0.001143296, %v747_v42  ;;  %v662_v58 = vmul.f32 %v661_v43, %v1859_v48  ;;  %v738_v59 = vmul.f32 %v737_v44, %v1892_v15 }
 0x21f   : > { %v699_v49 = vadd.f32 0.0036580483, %v698_v40  ;;  %v710_v50 = vadd.f32 0.014752088, %v709_v41  ;;  %v673_v53 = vmul.f32 %v672_v46, %v1859_v48  ;;  %v623_v3 = vadd.f32 0.18741608, %v622_v51 }
 0x220   : > { %v634_v52 = vadd.f32 0.4994258, %v633_v45  ;;  %v749_v2 = vmul.f32 %v748_v57, %v1892_v15  ;;  %v663_v8 = vadd.f32 0.18741608, %v662_v58  ;;  %v739_v9 = vadd.f32 0.0036580483, %v738_v59 }
 0x221   : > { %v711_v54 = vmul.f32 %v710_v50, %v1890_v14  ;;  %v674_v61 = vadd.f32 0.4994258, %v673_v53  ;;  %v700_v0 = vmul.f32 %v699_v49, %v1890_v14  ;;  %v624_v13 = vmul.f32 %v623_v3, %v1857_v47 }
 0x222   : > { %v635_v60 = vmul.f32 %v634_v52, %v1857_v47  ;;  %v750_v7 = vadd.f32 0.014752088, %v749_v2  ;;  %v664_v17 = vmul.f32 %v663_v8, %v1859_v48  ;;  %v740_v18 = vmul.f32 %v739_v9, %v1892_v15 }
 0x223   : > { %v712_v1 = vadd.f32 0.112945676, %v711_v54  ;;  %v675_v5 = vmul.f32 %v674_v61, %v1859_v48  ;;  %v701_v10 = vadd.f32 0.05243302, %v700_v0  ;;  %v625_v23 = vadd.f32 1.1283791, %v624_v13 }
 0x224   : > { %v636_v4 = vadd.f32 1.0, %v635_v60  ;;  %v751_v12 = vmul.f32 %v750_v7, %v1892_v15  ;;  %v665_v27 = vadd.f32 1.1283791, %v664_v17  ;;  %v741_v47 = vadd.f32 0.05243302, %v740_v18 }
 0x225   : > { %v713_v6 = vmul.f32 %v712_v1, %v1890_v14  ;;  %v676_v11 = vadd.f32 1.0, %v675_v5  ;;  %v702_v21 = vmul.f32 %v701_v10, %v1890_v14  ;;  %v626_v31 = vmul.f32 %v625_v23, %v1842_v37 }
 0x226   : > { %1227 = vrcp.f32 %v636_v4  ;;  %v752_v20 = vadd.f32 0.112945676, %v751_v12  ;;  %v648_v32 = vand.u32 2147483648, %v636_v4  ;;  %v646_v39 = vand.u32 2147483647, %v636_v4 }
 0x227   : > { %v714_v16 = vadd.f32 0.4994258, %v713_v6  ;;  %1229 = vrcp.f32 %v676_v11  ;;  %v703_v48 = vadd.f32 0.18741608, %v702_v21  ;;  %v666_v41 = vmul.f32 %v665_v27, %v1845_v38 }
 0x228   : > { %v753_v25 = vmul.f32 %v752_v20, %v1892_v15  ;;  %v742_v42 = vmul.f32 %v741_v47, %v1892_v15  ;;  %vm642_vm8 = vweird.f32 %v636_v4  ;;  %v688_v46 = vand.u32 2147483648, %v676_v11 }
 0x229   : > { %v715_v19 = vmul.f32 %v714_v16, %v1890_v14  ;;  %v704_v44 = vmul.f32 %v703_v48, %v1890_v14  ;;  %v649_v50 = vor.u32 1.1754944e-38, %v648_v32  ;;  %v686_v52 = vand.u32 2147483647, %v676_v11 }
 0x22a   : > { %v754_v30 = vadd.f32 0.4994258, %v753_v25  ;;  %vm647_vm11 = vcmp.eq.f32.partialorder %v646_v39, 8.507059e+37  ;;  %v743_v54 = vadd.f32 0.18741608, %v742_v42  ;;  %vm682_vm12 = vweird.f32 %v676_v11 }
 0x22b   : > { %v1928_v24 = vadd.f32 1.0, %v715_v19  ;;  %v705_v14 = vadd.f32 1.1283791, %v704_v44  ;;  %v689_v60 = vor.u32 1.1754944e-38, %v688_v46  ;;  %vm687_vm14 = vcmp.eq.f32.partialorder %v686_v52, 8.507059e+37 }
 0x22c   : > { %v1228_v22 = vpop.eup %1227  ;;  %v755_v40 = vmul.f32 %v754_v30, %v1892_v15  ;;  %v606_v6 = vmul.f32 0.5, %v1835_v33  ;;  %v744_v9 = vmul.f32 %v743_v54, %v1892_v15  ;;  %v607_v33 = vmul.f32 0.5, %v1837_v34 }
 0x22d   : > { %v638_v26 = vmul.f32 %v1228_v22, %v636_v4  ;;  %1231 = vrcp.f32 %v1928_v24  ;;  %v1230_v28 = vpop.eup %1229  ;;  %vm643_vm7 = vweird.f32 %v1228_v22  ;;  %v726_v1 = vand.u32 2147483647, %v1928_v24 }
 0x22e   : > { %v678_v35 = vmul.f32 %v1230_v28, %v676_v11  ;;  %v1937_v49 = vadd.f32 1.0, %v755_v40  ;;  %vm644_vm9 = vmor %vm642_vm8, %vm643_vm7  ;;  %vm683_vm10 = vweird.f32 %v1230_v28  ;;  %v728_v2 = vand.u32 2147483648, %v1928_v24 }
 0x22f   : > { %v639_v29 = vsub.f32 1.0, %v638_v26  ;;  %vm684_vm13 = vmor %vm682_vm12, %vm683_vm10  ;;  %vm722_vm0 = vweird.f32 %v1928_v24  ;;  %v706_v17 = vmul.f32 %v705_v14, %v1873_v62  ;;  %vm727_vm2 = vcmp.eq.f32.partialorder %v726_v1, 8.507059e+37 }
 0x230   : > { %v679_v43 = vsub.f32 1.0, %v678_v35  ;;  %1233 = vrcp.f32 %v1937_v49  ;;  %v729_v13 = vor.u32 1.1754944e-38, %v728_v2  ;;  %v745_v15 = vadd.f32 1.1283791, %v744_v9 }
 0x231   : > { %v640_v36 = vmul.f32 %v1228_v22, %v639_v29  ;;  %v766_v27 = vand.u32 2147483647, %v1937_v49  ;;  %vm762_vm4 = vweird.f32 %v1937_v49  ;;  %v608_v34 = vmul.f32 0.5, %v1865_v55 }
 0x232   : > { %v680_v51 = vmul.f32 %v1230_v28, %v679_v43  ;;  %v746_v29 = vmul.f32 %v745_v15, %v1876_v63  ;;  %v609_v39 = vmul.f32 0.5, %v1867_v56  ;;  %v782_v43 = vld [vmem:[#allocation3 + $0x8] sm:$0xff]  ;;  %v783_v63 = vld [vmem:[#allocation3] sm:$0xff] }
 0x233   : > { %v641_v45 = vadd.f32 %v1228_v22, %v640_v36  ;;  %v1232_v37 = vpop.eup %1231  ;;  %vm767_vm6 = vcmp.eq.f32.partialorder %v766_v27, 8.507059e+37 }
 0x234   : > { %v718_v38 = vmul.f32 %v1232_v37, %v1928_v24  ;;  %v681_v58 = vadd.f32 %v1230_v28, %v680_v51  ;;  %vm723_vm15 = vweird.f32 %v1232_v37  ;;  %v768_v24 = vand.u32 2147483648, %v1937_v49 }
 0x235   : > { %v645_v53 = vsel %vm644_vm9, %v1228_v22, %v641_v45  ;;  %vm724_vm1 = vmor %vm722_vm0, %vm723_vm15 }
 0x236   : > { %v650_v57 = vsel %vm647_vm11, %v649_v50, %v645_v53  ;;  %v719_v61 = vsub.f32 1.0, %v718_v38  ;;  %v685_v0 = vsel %vm684_vm13, %v1230_v28, %v681_v58  ;;  %v1234_v8 = vpop.eup %1233  ;;  %v769_v48 = vor.u32 1.1754944e-38, %v768_v24 }
 0x237   : > { %v651_v59 = vmul.f32 %v650_v57, %v626_v31  ;;  %v690_v4 = vsel %vm687_vm14, %v689_v60, %v685_v0  ;;  %v758_v16 = vmul.f32 %v1234_v8, %v1937_v49  ;;  %vm763_vm3 = vweird.f32 %v1234_v8 }
 0x238   : > { %v720_v5 = vmul.f32 %v1232_v37, %v719_v61  ;;  %v691_v7 = vmul.f32 %v690_v4, %v666_v41  ;;  %vm764_vm5 = vmor %vm762_vm4, %vm763_vm3 }
 0x239   : > { %v1068_v3 = vclamps-f32 %v651_v59, 1.0  ;;  %v759_v22 = vsub.f32 1.0, %v758_v16 }
 0x23a   : > { %v721_v11 = vadd.f32 %v1232_v37, %v720_v5  ;;  %v1069_v12 = vclamps-f32 %v691_v7, 1.0 }
 0x23b   : > { %v774_v10 = vadd.f32 1.0, %v1068_v3  ;;  %v760_v26 = vmul.f32 %v1234_v8, %v759_v22 }
 0x23c   : > { %v725_v19 = vsel %vm724_vm1, %v1232_v37, %v721_v11  ;;  %v775_v20 = vadd.f32 1.0, %v1069_v12 }
 0x23d   : > { %v778_v18 = vmul.f32 %v774_v10, %v606_v6  ;;  %v730_v21 = vsel %vm727_vm2, %v729_v13, %v725_v19  ;;  %v761_v62 = vadd.f32 %v1234_v8, %v760_v26 }
 0x23e   : > { %v731_v23 = vmul.f32 %v730_v21, %v706_v17  ;;  %v779_v25 = vmul.f32 %v775_v20, %v607_v33 }
 0x23f   : > { %832 = vmatmul.f32.vlgmr.msra.gmra.mxu2 %v778_v18  ;;  %v765_v30 = vsel %vm764_vm5, %v1234_v8, %v761_v62 }
 0x240   : > { %v1070_v47 = vclamps-f32 %v731_v23, 1.0  ;;  %855 = vmatmul.f32.vlgmr.msra.gmra.mxu3 %v779_v25  ;;  %v770_v32 = vsel %vm767_vm6, %v769_v48, %v765_v30 }
 0x241   : > { %v771_v35 = vmul.f32 %v770_v32, %v746_v29 }
 0x242   : > { %v776_v28 = vadd.f32 1.0, %v1070_v47 }
 0x243   : > { %v1071_v36 = vclamps-f32 %v771_v35, 1.0 }
 0x244   : > { %v780_v31 = vmul.f32 %v776_v28, %v608_v34 }
 0x245   : > { %v777_v40 = vadd.f32 1.0, %v1071_v36 }
 0x247   : > { %835 = vmatmul.f32.gmra.mxu2 %v780_v31  ;;  %v781_v41 = vmul.f32 %v777_v40, %v609_v39 }
 0x249   : > { %858 = vmatmul.f32.gmra.mxu3 %v781_v41 }
 0x2c2   : > { %v833_v42 = vpop.f32.mrf.mxu2 }
 0x2c3   : > { %v856_v55 = vpop.f32.mrf.mxu3 }
 0x2c4   : > { %v857_v44 = vadd.f32 %v856_v55, %v833_v42 }
 0x2c6   : > { %v862_v45 = vadd.f32 %v857_v44, %v782_v43 }
 0x2c8   : > { %864 = vst [vmem:[#allocation3 + $0x8] sm:$0xff] %v862_v45 }
 0x2ca   : > { %v836_v46 = vpop.f32.mrf.mxu2 }
 0x2cc   : > { %v859_v49 = vpop.f32.mrf.mxu3 }
 0x2cd   : > { %v860_v37 = vadd.f32 %v859_v49, %v836_v46  ;;  %869 = sbr.rel (%p1072_p13) target bundleno = 730 (0x2da), region = 76 }
 0x2cf   : > { %v863_v50 = vadd.f32 %v860_v37, %v783_v63 }
 0x2d1   : > { %865 = vst [vmem:[#allocation3] sm:$0xff] %v863_v50 }
 0x2d2   : > { %v870_v51 = vld [vmem:[#allocation3 + $0x8] sm:$0xff] }
 0x2d3   : > { %872 = vst [vmem:[%s1782_s2] sm:$0xff] %v870_v51 }
 0x2d8   : > { %v871_v56 = vld [vmem:[#allocation3] sm:$0xff] }
 0x2d9   : > { %873 = vst [vmem:[%s1782_s2 + $0x8] sm:$0xff] %v871_v56 }
 0x2da PF: > { %s2053_s12 = sld [smem:[#allocation17_spill]]  ;;  %s887_s1 = sshll.u32 %s1782_s2, 4  ;;  %s888_s1 = int_to_ptr.vmem [resolvable:$true] %s887_s1 }
 0x2db   : > { %s2054_s20 = sld [smem:[#allocation28_spill]]  ;;  %s875_s4 = scalar_lea.sflag [#allocation6], %s356_s7 }
 0x2e0   : > { %s1081_s8 = sshll.u32 %s2053_s12, 4 }
 0x2e1   : > { %s886_s16 = scalar_lea.hbm %s2054_s20, %s1081_s8  ;;  %s1405_s22 = scalar_lea.hbm %s2054_s20, 32 }
 0x2e2   : > { %s889_s30 = sshll.u32 %s886_s16, 4  ;;  %s890_s30 = int_to_ptr.hbm [resolvable:$true] %s889_s30 }
 0x2e3   : > { %s1399_s14 = sshra.s32 %s890_s30, 4  ;;  %s1400_s14 = int_to_ptr.hbm [resolvable:$true] %s1399_s14 }
 0x2e4   : > { %s1401_s23 = scalar_lea.hbm %s1400_s14, 16  ;;  %p1406_p4 = scmp.lt.s32.totalorder %s1400_s14, %s2054_s20 }
 0x2e5   : > { %p1402_p0 = scmp.ne.s32.totalorder %s1400_s14, %s1401_s23  ;;  %p1407_p5 = scmp.lt.s32.totalorder %s1405_s22, %s1401_s23 }
 0x2e7   : > { %p1403_p2 = pnand %p1402_p0, %p1724_p6  ;;  %p1408_p8 = por %p1407_p5, %p1406_p4 }
 0x2e9   : > { %p1404_p3 = pneg %p1403_p2 }
 0x2eb   : > { %p1409_p9 = pnand %p1408_p8, %p1404_p3 }
 0x2ed   : > { %1412 = shalt.err (!%p1409_p9)
}
 0x2ee   : > { %s1524_s7 = smov 128   ;;  %s1525_s2 = smov 8  }
 0x2ef   : > { %1094 = dma.vmem_to_hbm [thread:$0]  (%p1724_p6), %s888_s1, 256, %s890_s30, %s875_s4, %s1524_s7, %s1524_s7, %s1525_s2  }
 0x2f0 PF: > { %p1120_p10 = scmp.ge.s32.totalorder %s1515_s11, 2  ;;  %s904_s17 = sand.u32 1, %s1487_s27  }
 0x2f1   : > { %s905_s0 = scalar_lea.sflag [#allocation6], %s904_s17 }
 0x2f2   : > { %p1114_p1 = pnand %p1120_p10, %p1728_p7 }
 0x2f4   : > { %p1115_p12 = pneg %p1114_p1 }
 0x2f6   : > { %1470 = dma.done.wait (%p1115_p12), %s905_s0, 256  }
 0x2f7   : > { %1472 = vsyncadd (%p1115_p12), %s905_s0, 4294967040  ;;  %s24_s11 = sadd.s32 1, %s1515_s11   ;;  %s2055_s12 = sld [smem:[#allocation21_spill]] }
 0x2f8   : > { %p21_p11 = scmp.ge.s32.totalorder %s24_s11, 6   ;;  %s2056_s19 = sld [smem:[#allocation22_spill]] }
 0x2f9   : > { %s2057_s8 = sld [smem:[#allocation18_spill]]  ;;  %s2060_s24 = smov %s1479_s25 }
 0x2fa   : > { %s2058_s13 = sld [smem:[#allocation19_spill]]  ;;  %s2061_s25 = smov %s1483_s26 }
 0x2fb   : > { %s2059_s10 = sld [smem:[#allocation20_spill]]  ;;  %s2063_s27 = smov %s1491_s28 }
 0x2fc   : > { %s2064_s28 = smov %s1495_s29  ;;  %s2066_s30 = smov %s1507_s9 }
 0x2fd   : > { %s2062_s26 = smov %s2055_s12  ;;  %23 = sbr.rel (!%p21_p11) target bundleno = 17 (0x11), region = 138 }
 0x2fe   : > { %s2065_s29 = smov %s2056_s19 }
 0x300   : > { %s2067_s9 = smov %s2058_s13 }
 0x302   :  { %911 = vsyncpa [#allocation5], 1 }
 0x303   :  { %913 = vsyncpa [#allocation5 + $0x1], 1 }
 0x304   :  { %914 = vsyncpa [#allocation8], 1 }
 0x305   :  { %915 = vsyncpa [#allocation6], 1 }
 0x306   :  { %917 = vsyncpa [#allocation6 + $0x1], 1 }

</bundles_post_ra>
